<compile_context>
chip_gen: v7x
topology: tpu7x:2x2x1
jax: 0.10.0
libtpu: 0.0.40
codegen_flags: <defaults>
</compile_context>

<pallas_src>
import jax
import jax.numpy as jnp
from jax.experimental import pallas as pl
from jax.experimental.pallas import tpu as pltpu


# ----------------------------- Pallas kernel --------------------------------

def _make_decoder_kernel(n_hidden):
    """Fused MLP kernel.

    refs = (x, w0, b0, ..., w_{H-1}, b_{H-1}, w_last_tile, b_last_tile, out).
    Hidden weights are full arrays resident in VMEM; the last-layer weight/bias
    and the output are tiled along the output-feature axis.
    """

    def kernel(*refs):
        x_ref = refs[0]
        o_ref = refs[-1]
        p = refs[1:-1]

        h = x_ref[...].astype(jnp.float32)                     # (TM, latent)

        # Hidden layers: bf16 MXU matmul w/ f32 accumulation, f32 bias+ReLU (VPU).
        for i in range(n_hidden):
            w = p[2 * i][...]                                  # (d_in, d_out) bf16
            b = p[2 * i + 1][...]                              # (1,   d_out)  f32
            h = jnp.dot(h.astype(jnp.bfloat16), w,
                        preferred_element_type=jnp.float32) + b
            h = jnp.maximum(h, 0.0)

        # Output layer tile: Linear + numerically stable Sigmoid (EUP tanh).
        w_last = p[2 * n_hidden][...]                          # (d_in_last, tn) bf16
        b_last = p[2 * n_hidden + 1][...]                      # (1,         tn) f32
        z = jnp.dot(h.astype(jnp.bfloat16), w_last,
                    preferred_element_type=jnp.float32) + b_last
        o_ref[...] = (0.5 * jnp.tanh(0.5 * z) + 0.5).astype(o_ref.dtype)

    return kernel


# ------------------------------- wrapper -------------------------------------

def _round_up(x, m):
    return (x + m - 1) // m * m


def _pick_out_tile(out_features):
    """Largest lane-aligned output tile that still gives >=2 grid steps."""
    for cand in (512, 256, 128):
        if out_features % cand == 0 and out_features // cand >= 2:
            return cand
    return out_features


def ae_decoder_forward(params, imgs, *, out_dtype=jnp.float32):
    """Matches AEDecoder.forward: imgs.view(-1, latent) -> decoder(imgs)."""
    ws, bs = params["ws"], params["bs"]
    latent = ws[0].shape[0]
    out_features = ws[-1].shape[1]
    d_in_last = ws[-1].shape[0]
    n_hidden = len(ws) - 1

    x = imgs.reshape(-1, latent).astype(jnp.float32)           # view(-1, latent)
    n = x.shape[0]

    # Row tile: as large as possible (HBM-writeback bound at scale).
    tm = min(512, _round_up(n, 8))
    n_pad = _round_up(n, tm)
    if n_pad != n:
        x = jnp.pad(x, ((0, n_pad - n), (0, 0)))

    # Output-feature tile: keeps both v7x TCs busy even at tiny batch and
    # bounds the resident last-layer weight tile.
    tn = _pick_out_tile(out_features)
    grid = (n_pad // tm, out_features // tn)

    in_specs = [pl.BlockSpec((tm, latent), lambda i, j: (i, 0))]
    operands = [x]

    # Grid-invariant hidden weights/biases: whole array resident in VMEM once
    # (no double-buffering of constants).
    for li in range(n_hidden):
        in_specs.append(pl.BlockSpec(memory_space=pltpu.MemorySpace.VMEM))
        in_specs.append(pl.BlockSpec(memory_space=pltpu.MemorySpace.VMEM))
        operands.append(ws[li].astype(jnp.bfloat16))
        operands.append(bs[li].reshape(1, -1).astype(jnp.float32))

    # Last layer: tiled along the output-feature axis (pipelined over j).
    in_specs.append(pl.BlockSpec((d_in_last, tn), lambda i, j: (0, j)))
    in_specs.append(pl.BlockSpec((1, tn), lambda i, j: (0, j)))
    operands.append(ws[-1].astype(jnp.bfloat16))
    operands.append(bs[-1].reshape(1, -1).astype(jnp.float32))

    # Explicit VMEM budget (v7x: 64 MiB physical, 32 MiB default scoped).
    out_bytes = jnp.dtype(out_dtype).itemsize
    est = tm * latent * 4 * 2                                   # x tiles (x2 bufs)
    for li in range(n_hidden):
        est += ws[li].size * 2 + bs[li].size * 4                # resident constants
    est += d_in_last * tn * 2 * 2 + tn * 4 * 2                  # last W/b tiles (x2 bufs)
    est += tm * tn * out_bytes * 2                              # out tiles (x2 bufs)
    est += tm * max([tn] + [w.shape[1] for w in ws]) * 4 * 4    # live intermediates
    vmem_limit = int(min(max(2 * est, 32 * 1024 * 1024), 128 * 1024 * 1024))

    out = pl.pallas_call(
        _make_decoder_kernel(n_hidden),
        out_shape=jax.ShapeDtypeStruct((n_pad, out_features), out_dtype),
        grid=grid,
        in_specs=in_specs,
        out_specs=pl.BlockSpec((tm, tn), lambda i, j: (i, j)),
        compiler_params=pltpu.CompilerParams(
            dimension_semantics=("parallel", "parallel"),
            vmem_limit_bytes=vmem_limit),
    )(*operands)
    return out[:n]


# --------------------------- parameters (init) --------------------------------

def init_params(key, img_shape, latent, hidden_dims):
    """PyTorch-style Linear init (U(-1/sqrt(fan_in), 1/sqrt(fan_in))).
    Weights stored pre-transposed as (in, out) and in bf16 (MXU operands);
    biases stay f32 (added to the f32 accumulator)."""
    out_c, out_h, out_w = img_shape
    out_features = out_c * out_h * out_w
    dims = [latent] + list(hidden_dims) + [out_features]
    ws, bs = [], []
    for i in range(len(dims) - 1):
        key, kw, kb = jax.random.split(key, 3)
        bound = 1.0 / (dims[i] ** 0.5)
        w = jax.random.uniform(kw, (dims[i], dims[i + 1]), jnp.float32, -bound, bound)
        b = jax.random.uniform(kb, (dims[i + 1],), jnp.float32, -bound, bound)
        ws.append(w.astype(jnp.bfloat16))
        bs.append(b)
    return {"ws": ws, "bs": bs}


# ---------------------------------- main --------------------------------------

if __name__ == "__main__":
    img_shape = (4, 16, 16)           # (C, H, W) -> out_features = 1024 (lane-dense)
    latent = 16
    hidden_dims = (32, 64)
    batch = 2

    key = jax.random.PRNGKey(0)
    key, pkey, xkey = jax.random.split(key, 3)
    params = init_params(pkey, img_shape, latent, hidden_dims)
    imgs = jax.random.normal(xkey, (batch, latent), jnp.float32)

    out = ae_decoder_forward(params, imgs)
    out = jax.block_until_ready(out)

    assert out.shape == (batch, img_shape[0] * img_shape[1] * img_shape[2])
    assert out.dtype == jnp.float32
    assert bool(jnp.all(jnp.isfinite(out)))
    assert bool(jnp.all((out >= 0.0) & (out <= 1.0)))   # sigmoid range
    print("KERNEL_OK")
</pallas_src>

<mosaic_0001>
module attributes {stable_mosaic.version = 11 : i64} {
  func.func @kernel(%arg0: i32, %arg1: i32, %arg2: memref<8x16xf32, #tpu.memory_space<vmem>>, %arg3: memref<16x32xbf16, #tpu.memory_space<vmem>>, %arg4: memref<1x32xf32, #tpu.memory_space<vmem>>, %arg5: memref<32x64xbf16, #tpu.memory_space<vmem>>, %arg6: memref<1x64xf32, #tpu.memory_space<vmem>>, %arg7: memref<64x512xbf16, #tpu.memory_space<vmem>>, %arg8: memref<1x512xf32, #tpu.memory_space<vmem>>, %arg9: memref<8x512xf32, #tpu.memory_space<vmem>>) attributes {dimension_semantics = [#tpu.dimension_semantics<parallel>, #tpu.dimension_semantics<parallel>], iteration_bounds = array<i64: 1, 2>, scalar_prefetch = 0 : i64, scratch_operands = 0 : i64, tpu.core_type = #tpu.core_type<tc>, window_params = [{transform_indices = @transform_0, window_bounds = array<i64: 8, 16>}, {pipeline_mode = #tpu.pipeline_mode<synchronous>, transform_indices = @transform_1, window_bounds = array<i64: 16, 32>}, {pipeline_mode = #tpu.pipeline_mode<synchronous>, transform_indices = @transform_2, window_bounds = array<i64: 1, 32>}, {pipeline_mode = #tpu.pipeline_mode<synchronous>, transform_indices = @transform_3, window_bounds = array<i64: 32, 64>}, {pipeline_mode = #tpu.pipeline_mode<synchronous>, transform_indices = @transform_4, window_bounds = array<i64: 1, 64>}, {transform_indices = @transform_5, window_bounds = array<i64: 64, 512>}, {transform_indices = @transform_6, window_bounds = array<i64: 1, 512>}, {transform_indices = @transform_7, window_bounds = array<i64: 8, 512>}]} {
    %c0 = arith.constant 0 : index
    %c0_0 = arith.constant 0 : index
    %0 = vector.load %arg2[%c0, %c0_0] : memref<8x16xf32, #tpu.memory_space<vmem>>, vector<8x16xf32>
    %c0_1 = arith.constant 0 : index
    %c0_2 = arith.constant 0 : index
    %1 = vector.load %arg3[%c0_1, %c0_2] : memref<16x32xbf16, #tpu.memory_space<vmem>>, vector<16x32xbf16>
    %c0_3 = arith.constant 0 : index
    %c0_4 = arith.constant 0 : index
    %2 = vector.load %arg4[%c0_3, %c0_4] : memref<1x32xf32, #tpu.memory_space<vmem>>, vector<1x32xf32>
    %3 = arith.truncf %0 : vector<8x16xf32> to vector<8x16xbf16>
    %cst = arith.constant dense<0.000000e+00> : vector<8x32xf32>
    %4 = tpu.matmul %3, %1, %cst {dimension_numbers = #tpu.dot_dimension_numbers<[1], [0], [0], [1], [0, 0, 1, 1], [], []>} : vector<8x16xbf16>, vector<16x32xbf16>, vector<8x32xf32> -> vector<8x32xf32>
    %5 = vector.broadcast %2 : vector<1x32xf32> to vector<8x32xf32>
    %6 = arith.addf %4, %5 : vector<8x32xf32>
    %cst_5 = arith.constant 0.000000e+00 : f32
    %7 = vector.broadcast %cst_5 : f32 to vector<8x32xf32>
    %8 = arith.maximumf %6, %7 : vector<8x32xf32>
    %c0_6 = arith.constant 0 : index
    %c0_7 = arith.constant 0 : index
    %9 = vector.load %arg5[%c0_6, %c0_7] : memref<32x64xbf16, #tpu.memory_space<vmem>>, vector<32x64xbf16>
    %c0_8 = arith.constant 0 : index
    %c0_9 = arith.constant 0 : index
    %10 = vector.load %arg6[%c0_8, %c0_9] : memref<1x64xf32, #tpu.memory_space<vmem>>, vector<1x64xf32>
    %11 = arith.truncf %8 : vector<8x32xf32> to vector<8x32xbf16>
    %cst_10 = arith.constant dense<0.000000e+00> : vector<8x64xf32>
    %12 = tpu.matmul %11, %9, %cst_10 {dimension_numbers = #tpu.dot_dimension_numbers<[1], [0], [0], [1], [0, 0, 1, 1], [], []>} : vector<8x32xbf16>, vector<32x64xbf16>, vector<8x64xf32> -> vector<8x64xf32>
    %13 = vector.broadcast %10 : vector<1x64xf32> to vector<8x64xf32>
    %14 = arith.addf %12, %13 : vector<8x64xf32>
    %cst_11 = arith.constant 0.000000e+00 : f32
    %15 = vector.broadcast %cst_11 : f32 to vector<8x64xf32>
    %16 = arith.maximumf %14, %15 : vector<8x64xf32>
    %c0_12 = arith.constant 0 : index
    %c0_13 = arith.constant 0 : index
    %17 = vector.load %arg7[%c0_12, %c0_13] : memref<64x512xbf16, #tpu.memory_space<vmem>>, vector<64x512xbf16>
    %c0_14 = arith.constant 0 : index
    %c0_15 = arith.constant 0 : index
    %18 = vector.load %arg8[%c0_14, %c0_15] : memref<1x512xf32, #tpu.memory_space<vmem>>, vector<1x512xf32>
    %19 = arith.truncf %16 : vector<8x64xf32> to vector<8x64xbf16>
    %cst_16 = arith.constant dense<0.000000e+00> : vector<8x512xf32>
    %20 = tpu.matmul %19, %17, %cst_16 {dimension_numbers = #tpu.dot_dimension_numbers<[1], [0], [0], [1], [0, 0, 1, 1], [], []>} : vector<8x64xbf16>, vector<64x512xbf16>, vector<8x512xf32> -> vector<8x512xf32>
    %21 = vector.broadcast %18 : vector<1x512xf32> to vector<8x512xf32>
    %22 = arith.addf %20, %21 : vector<8x512xf32>
    %cst_17 = arith.constant 5.000000e-01 : f32
    %23 = vector.broadcast %cst_17 : f32 to vector<8x512xf32>
    %24 = arith.mulf %23, %22 : vector<8x512xf32>
    %25 = math.tanh %24 : vector<8x512xf32>
    %cst_18 = arith.constant 5.000000e-01 : f32
    %26 = vector.broadcast %cst_18 : f32 to vector<8x512xf32>
    %27 = arith.mulf %26, %25 : vector<8x512xf32>
    %cst_19 = arith.constant 5.000000e-01 : f32
    %28 = vector.broadcast %cst_19 : f32 to vector<8x512xf32>
    %29 = arith.addf %27, %28 : vector<8x512xf32>
    %c0_20 = arith.constant 0 : index
    %c0_21 = arith.constant 0 : index
    %30 = vector.load %arg9[%c0_20, %c0_21] : memref<8x512xf32, #tpu.memory_space<vmem>>, vector<8x512xf32>
    tpu.vector_store %arg9[%c0_20, %c0_21], %29 {strides = array<i32>} : memref<8x512xf32, #tpu.memory_space<vmem>>, vector<8x512xf32>,
    return
  }
  func.func @transform_0(%arg0: i32, %arg1: i32) -> (i32, i32) {
    %c0_i32 = arith.constant 0 : i32
    %c0_i32_0 = arith.constant 0 : i32
    return %arg0, %c0_i32 : i32, i32
  }
  func.func @transform_1(%arg0: i32, %arg1: i32) -> (i32, i32) {
    %c0_i32 = arith.constant 0 : i32
    %c0_i32_0 = arith.constant 0 : i32
    %c0_i32_1 = arith.constant 0 : i32
    return %c0_i32, %c0_i32_0 : i32, i32
  }
  func.func @transform_2(%arg0: i32, %arg1: i32) -> (i32, i32) {
    %c0_i32 = arith.constant 0 : i32
    %c0_i32_0 = arith.constant 0 : i32
    %c0_i32_1 = arith.constant 0 : i32
    return %c0_i32, %c0_i32_0 : i32, i32
  }
  func.func @transform_3(%arg0: i32, %arg1: i32) -> (i32, i32) {
    %c0_i32 = arith.constant 0 : i32
    %c0_i32_0 = arith.constant 0 : i32
    %c0_i32_1 = arith.constant 0 : i32
    return %c0_i32, %c0_i32_0 : i32, i32
  }
  func.func @transform_4(%arg0: i32, %arg1: i32) -> (i32, i32) {
    %c0_i32 = arith.constant 0 : i32
    %c0_i32_0 = arith.constant 0 : i32
    %c0_i32_1 = arith.constant 0 : i32
    return %c0_i32, %c0_i32_0 : i32, i32
  }
  func.func @transform_5(%arg0: i32, %arg1: i32) -> (i32, i32) {
    %c0_i32 = arith.constant 0 : i32
    %c0_i32_0 = arith.constant 0 : i32
    return %c0_i32, %arg1 : i32, i32
  }
  func.func @transform_6(%arg0: i32, %arg1: i32) -> (i32, i32) {
    %c0_i32 = arith.constant 0 : i32
    %c0_i32_0 = arith.constant 0 : i32
    return %c0_i32, %arg1 : i32, i32
  }
  func.func @transform_7(%arg0: i32, %arg1: i32) -> (i32, i32) {
    %c0_i32 = arith.constant 0 : i32
    return %arg0, %arg1 : i32, i32
  }
}

</mosaic_0001>

<bundles_post_ra>
// kernel: tpu_custom_call.1
= control target key start
LH: loop header
LB: loop body
LE: loop exit
PB: predicated region body
PF: predicated region fallthrough
CT: control target
= control target key end

     0   :  { %s1635_s0 = inlined_call_operand.hbm [shape: f32[8,16], index: 0, kind: input, shape index: {}]   ;;  %s1636_s1 = inlined_call_operand.hbm [shape: bf16[16,32], index: 1, kind: input, shape index: {}]   ;;  %s1637_s2 = inlined_call_operand.vmem [shape: f32[1,32], index: 2, kind: input, shape index: {}]   ;;  %s1638_s3 = inlined_call_operand.hbm [shape: bf16[32,64], index: 3, kind: input, shape index: {}]   ;;  %s1639_s4 = inlined_call_operand.vmem [shape: f32[1,64], index: 4, kind: input, shape index: {}]   ;;  %s1640_s5 = inlined_call_operand.hbm [shape: bf16[64,1024], index: 5, kind: input, shape index: {}]   ;;  %s1641_s6 = inlined_call_operand.vmem [shape: f32[1,1024], index: 6, kind: input, shape index: {}]   ;;  %s1642_s7 = inlined_call_operand.hbm [shape: f32[8,1024], index: 7, kind: output, shape index: {}]  }
   0x1   :  { %1656 = sst [smem:[#allocation19_spill]] %s1642_s7 }
   0x2   :  { %12 = vsyncpa [#allocation3], 0 }
   0x3   :  { %13 = vsyncpa [#allocation6], 0 }
   0x4   :  { %14 = vsyncpa [#allocation9], 0 }
   0x5   :  { %16 = vsyncpa [#allocation9 + $0x1], 0 }
   0x6   :  { %17 = vsyncpa [#allocation4], 0 }
   0x7   :  { %19 = vsyncpa [#allocation4 + $0x1], 0  ;;  %s1341_s24 = smov 0   ;;  %s1343_s25 = smov 0  }
   0x8   :  { %s1345_s26 = smov 0   ;;  %s1347_s27 = smov 0  }
   0x9   :  { %s1349_s28 = smov 0   ;;  %s1351_s29 = smov 0  }
   0xa LB: > { %1657 = sst [smem:[#allocation15_spill]] %s1266_s24  ;;  %s878_s30 = sadd.s32 4294967295, %s1286_s29   ;;  %s1286_s29 = sphi %s1351_s29, %s1687_s29   ;;  %s1282_s28 = sphi %s1349_s28, %s1686_s28   ;;  %s1278_s27 = sphi %s1347_s27, %s1685_s27   ;;  %s1274_s26 = sphi %s1345_s26, %s1684_s26   ;;  %s1270_s25 = sphi %s1343_s25, %s1683_s25   ;;  %s1266_s24 = sphi %s1341_s24, %s1682_s24  }
   0xb   : > { %1658 = sst [smem:[#allocation16_spill]] %s1286_s29  ;;  %s879_s8 = sadd.s32 4294967294, %s1286_s29  }
   0xc   : > { %p161_p0 = scmp.ne.s32.totalorder %s1274_s26, %s1270_s25  ;;  %p162_p1 = scmp.eq.s32.totalorder %s1286_s29, 0 }
   0xd   : > { %p167_p2 = scmp.ne.s32.totalorder %s1270_s25, %s1266_s24  ;;  %p1378_p3 = scmp.eq.s32.totalorder %s878_s30, 0 }
   0xe   : > { %p1382_p4 = por %p162_p1, %p161_p0  ;;  %p219_p5 = scmp.eq.s32.totalorder %s878_s30, 1 }
   0xf   : > { %s1659_s9 = scalar_select %p1378_p3, 1, 0 }
  0x10   : > { %p1388_p6 = por %p1378_p3, %p167_p2  ;;  %p225_p7 = scmp.eq.s32.totalorder %s879_s8, 1 }
  0x11   : > { %p1392_p8 = por %p219_p5, %p161_p0  ;;  %p880_p9 = scmp.ge.s32.totalorder %s1286_s29, 1 }
  0x12   : > { %s1661_s11 = scalar_select %p1388_p6, 1, 0 }
  0x13   : > { %s1662_s12 = scalar_select %p1392_p8, 1, 0 }
  0x14   : > { %p1397_p10 = por %p225_p7, %p167_p2  ;;  %p232_p11 = scmp.lt.s32.totalorder %s1286_s29, 3 }
  0x15   : > { %1663 = sst [smem:[#allocation17_spill]] %s1662_s12  ;;  %s1288_s15 = smov [#allocation5]  }
  0x16   : > { %s1664_s13 = scalar_select %p1397_p10, 1, 0 }
  0x17   : > { %p1402_p12 = pnand %p880_p9, %p232_p11  ;;  %s257_s16 = sshll.u32 %s1288_s15, 4  ;;  %s258_s16 = int_to_ptr.vmem [resolvable:$true] %s257_s16 }
  0x18   : > { %1665 = sst [smem:[#allocation18_spill]] %s1664_s13  ;;  %p983_p1 = scmp.lt.s32.totalorder %s1286_s29, 2 }
  0x19   : > { %s1666_s14 = scalar_select %p1402_p12, 1, 0 }
  0x1a   : > { %p962_p13 = pneg %p1402_p12  ;;  %p1418_p2 = pnand %p983_p1, %p1382_p4 }
  0x1b   : > { %s1082_s21 = scalar_lea.hbm %s1636_s1, 128 }
  0x1c   : > { %p1412_p5 = pnand %p962_p13, %p1378_p3  ;;  %p1083_p7 = scmp.ne.s32.totalorder %s1636_s1, %s1082_s21 }
  0x1d   : > { %s1668_s18 = scalar_select %p1418_p2, 1, 0 }
  0x1e   : > { %p1430_p9 = pneg %p1412_p5  ;;  %p1089_p13 = scmp.lt.u32.totalorder %s1082_s21, %s1636_s1 }
  0x20   : > { %p1085_p11 = pnand %p1430_p9, %p1083_p7 }
  0x22   : > { %p1086_p4 = pneg %p1085_p11 }
  0x24   : > { %p1091_p1 = pnand %p1089_p13, %p1086_p4 }
  0x26   : > { %1094 = shalt.err (!%p1091_p1)
}
  0x27   : > { %s1095_s15 = scalar_lea.vmem %s258_s16, 128  ;;  %p1103_p6 = scmp.lt.s32.totalorder %s258_s16, %s258_s16 }
  0x28   : > { %p1096_p0 = scmp.ne.s32.totalorder %s258_s16, %s1095_s15  ;;  %p1104_p3 = scmp.lt.s32.totalorder %s1095_s15, %s1095_s15 }
  0x2a   : > { %p1098_p10 = pnand %p1096_p0, %p1430_p9  ;;  %p1105_p12 = por %p1104_p3, %p1103_p6 }
  0x2c   : > { %p1099_p8 = pneg %p1098_p10 }
  0x2e   : > { %p1106_p2 = pnand %p1105_p12, %p1099_p8 }
  0x30   : > { %1109 = shalt.err (!%p1106_p2)
}
  0x31   : > { %s1289_s19 = smov 64   ;;  %s1290_s20 = smov 4  }
  0x32   : > { %968 = dma.hbm_to_vmem [thread:$0]  (!%p1412_p5), %s1636_s1, 128, %s258_s16, [#allocation6], %s1289_s19, %s1289_s19, %s1290_s20  }
  0x33   : > { %s1291_s23 = smov [#allocation2]   ;;  %s1110_s29 = scalar_lea.hbm %s1635_s0, 128 }
  0x34   : > { %s247_s8 = sshll.u32 %s1291_s23, 4  ;;  %p1111_p3 = scmp.ne.s32.totalorder %s1635_s0, %s1110_s29  ;;  %s248_s8 = int_to_ptr.vmem [resolvable:$true] %s247_s8 }
  0x35   : > { %p1117_p10 = scmp.lt.u32.totalorder %s1110_s29, %s1635_s0 }
  0x36   : > { %p1113_p6 = pnand %p1111_p3, %p1430_p9 }
  0x38   : > { %p1114_p8 = pneg %p1113_p6 }
  0x3a   : > { %p1119_p12 = pnand %p1117_p10, %p1114_p8 }
  0x3c   : > { %1122 = shalt.err (!%p1119_p12)
}
  0x3d   : > { %s1123_s16 = scalar_lea.vmem %s248_s8, 128  ;;  %p1131_p11 = scmp.lt.s32.totalorder %s248_s8, %s248_s8 }
  0x3e   : > { %p1124_p0 = scmp.ne.s32.totalorder %s248_s8, %s1123_s16  ;;  %p1132_p4 = scmp.lt.s32.totalorder %s1123_s16, %s1123_s16 }
  0x40   : > { %p1126_p2 = pnand %p1124_p0, %p1430_p9  ;;  %p1133_p13 = por %p1132_p4, %p1131_p11 }
  0x42   : > { %p1127_p7 = pneg %p1126_p2 }
  0x44   : > { %p1134_p1 = pnand %p1133_p13, %p1127_p7 }
  0x46   : > { %1137 = shalt.err (!%p1134_p1)
}
  0x47   : > { %965 = dma.hbm_to_vmem [thread:$0]  (!%p1412_p5), %s1635_s0, 128, %s248_s8, [#allocation3]  }
  0x48   : > { %s1292_s7 = smov [#allocation7]   ;;  %s1138_s22 = scalar_lea.hbm %s1638_s3, 256 }
  0x49   : > { %s273_s29 = sshll.u32 %s1292_s7, 4  ;;  %p1139_p3 = scmp.ne.s32.totalorder %s1638_s3, %s1138_s22  ;;  %s274_s29 = int_to_ptr.vmem [resolvable:$true] %s273_s29 }
  0x4a   : > { %p1145_p10 = scmp.lt.u32.totalorder %s1138_s22, %s1638_s3 }
  0x4b   : > { %p1141_p6 = pnand %p1139_p3, %p1430_p9 }
  0x4d   : > { %p1142_p8 = pneg %p1141_p6 }
  0x4f   : > { %p1147_p12 = pnand %p1145_p10, %p1142_p8 }
  0x51   : > { %1150 = shalt.err (!%p1147_p12)
}
  0x52   : > { %s1151_s8 = scalar_lea.vmem %s274_s29, 256  ;;  %p1159_p11 = scmp.lt.s32.totalorder %s274_s29, %s274_s29 }
  0x53   : > { %p1152_p0 = scmp.ne.s32.totalorder %s274_s29, %s1151_s8  ;;  %p1160_p4 = scmp.lt.s32.totalorder %s1151_s8, %s1151_s8 }
  0x55   : > { %p1154_p2 = pnand %p1152_p0, %p1430_p9  ;;  %p1161_p13 = por %p1160_p4, %p1159_p11 }
  0x57   : > { %p1155_p7 = pneg %p1154_p2 }
  0x59   : > { %p1162_p1 = pnand %p1161_p13, %p1155_p7 }
  0x5b   : > { %1165 = shalt.err (!%p1162_p1)
}
  0x5c   : > { %971 = dma.hbm_to_vmem [thread:$0]  (!%p1412_p5), %s1638_s3, 256, %s274_s29, [#allocation6], %s1289_s19, %s1289_s19, %s1290_s20  }
  0x5d   : > { %s34_s30 = sadd.s32 1, %s1282_s28  ;;  %s154_s7 = sadd.s32 1, %s1274_s26 }
  0x5e   : > { %p35_p9 = scmp.ge.s32.totalorder %s34_s30, 2  ;;  %s290_s12 = sand.u32 1, %s1274_s26  }
  0x5f   : > { %s885_s17 = sshll.u32 %s290_s12, 7  ;;  %s925_s21 = sshll.u32 %s1282_s28, 8 }
  0x60   : > { %s1689_s30 = smov (%p35_p9, %s34_s30), 0  ;;  %s1499_s15 = scalar_lea.hbm %s1640_s5, %s925_s21 }
  0x61   : > { %s151_s22 = ssub.s32 %s1282_s28, %s1689_s30  ;;  %s294_s19 = scalar_lea.vmem [#allocation8], %s885_s17 }
  0x62   : > { %p152_p5 = scmp.eq.s32.totalorder %s151_s22, 0  ;;  %s301_s20 = sshll.u32 %s294_s19, 4  ;;  %s1501_s20 = int_to_ptr.vmem [resolvable:$true] %s301_s20 }
  0x63   : > { %s1506_s16 = scalar_lea.sflag [#allocation9], %s290_s12  ;;  %s1166_s8 = scalar_lea.hbm %s1499_s15, 2048 }
  0x64   : > { %s1504_s29 = scalar_select %p152_p5, %s1274_s26, %s154_s7  }
  0x65   : > { %p1167_p3 = scmp.ne.s32.totalorder %s1499_s15, %s1166_s8  ;;  %p1670_p6 = scmp.ne.s32.totalorder %s1668_s18, 0 }
  0x66   : > { %s1171_s21 = scalar_lea.hbm %s1640_s5, 4096  ;;  %p1172_p0 = scmp.lt.u32.totalorder %s1499_s15, %s1640_s5 }
  0x67   : > { %p1168_p8 = pneg %p1670_p6  ;;  %p1173_p2 = scmp.lt.u32.totalorder %s1171_s21, %s1166_s8 }
  0x68   : > { %p1175_p11 = scmp.lt.u32.totalorder %s1166_s8, %s1499_s15 }
  0x69   : > { %p1169_p10 = pnand %p1168_p8, %p1167_p3  ;;  %p1174_p7 = por %p1173_p2, %p1172_p0 }
  0x6b   : > { %p1170_p12 = pneg %p1169_p10  ;;  %p1176_p4 = por %p1175_p11, %p1174_p7 }
  0x6d   : > { %p1177_p13 = pnand %p1176_p4, %p1170_p12 }
  0x6f   : > { %1180 = shalt.err (!%p1177_p13)
}
  0x70   : > { %s1181_s7 = scalar_lea.vmem %s1501_s20, 2048  ;;  %s1293_s12 = smov [#allocation8]  }
  0x71   : > { %p1182_p1 = scmp.ne.s32.totalorder %s1501_s20, %s1181_s7  ;;  %s1186_s23 = sshll.u32 %s1293_s12, 4  ;;  %s1187_s23 = int_to_ptr.vmem [resolvable:$false] %s1186_s23 }
  0x72   : > { %s1188_s10 = scalar_lea.vmem %s1187_s23, 4096  ;;  %p1189_p3 = scmp.lt.s32.totalorder %s1501_s20, %s1187_s23 }
  0x73   : > { %p1184_p9 = pnand %p1182_p1, %p1168_p8  ;;  %p1190_p10 = scmp.lt.s32.totalorder %s1188_s10, %s1181_s7 }
  0x75   : > { %p1185_p5 = pneg %p1184_p9  ;;  %p1191_p0 = por %p1190_p10, %p1189_p3 }
  0x77   : > { %p1192_p2 = pnand %p1191_p0, %p1185_p5 }
  0x79   : > { %1195 = shalt.err (!%p1192_p2)
}
  0x7a   : > { %s1294_s19 = smov 512   ;;  %s1295_s8 = smov 256  }
  0x7b   : > { %s1296_s24 = smov 16   ;;  %p1671_p8 = scmp.ne.s32.totalorder %s1666_s14, 0 }
  0x7c   : > { %975 = dma.hbm_to_vmem [thread:$0]  (!%p1670_p6), %s1499_s15, 2048, %s1501_s20, %s1506_s16, %s1294_s19, %s1295_s8, %s1296_s24  }
  0x7d   : > { %321 = sbr.rel (%p1671_p8) target bundleno = 829 (0x33d), region = 48  ;;  %p1672_p12 = scmp.ne.s32.totalorder (!%p1671_p8), %s1659_s9, 0 }
  0x84   : > { %1249 = dma.done.wait (%p1672_p12), [#allocation3], 128  }
  0x85   : > { %1251 = vsyncadd (%p1672_p12), [#allocation3], 4294967168 }
  0x86   : > { %1253 = dma.done.wait (%p1672_p12), [#allocation6], 384  }
  0x87   : > { %1255 = vsyncadd (%p1672_p12), [#allocation6], 4294966912  ;;  %s1545_s13 = sand.u32 1, %s1270_s25   ;;  %p1673_p6 = scmp.ne.s32.totalorder %s1661_s11, 0 }
  0x88   : > { %s892_s14 = sshll.u32 %s1545_s13, 7  ;;  %s336_s18 = scalar_lea.sflag [#allocation9], %s1545_s13 }
  0x89   : > { %s1549_s15 = scalar_lea.vmem [#allocation8], %s892_s14 }
  0x8a   : > { %1257 = dma.done.wait (%p1673_p6), %s336_s18, 2048  }
  0x8b   : > { %1259 = vsyncadd (%p1673_p6), %s336_s18, 4294965248  ;;  %v1297_v0 = vmov 0.0   ;;  %vm1298_vm0 = vmmov 0   ;;  %v1047_v1 = vld [vmem:[#allocation5] sm:$0xff]   ;;  %v382_v2 = vld [vmem:[#allocation2] sm:$0xff]  ;;  %vm399_vm1 = vcmask 130048   ;;  %v532_v39 = vlaneseq }
  0x8c   : > { %932 = vmatprep.subr.bf16.mxu0 %v1297_v0  ;;  %934 = vmatprep.mubr.msk.bf16.mxu0 %vm1298_vm0, %v1297_v0  ;;  %v386_v3 = vpack.c.bf16 %v382_v2, %v382_v2  ;;  %v1048_v4 = vld [vmem:[#allocation7] sm:$0xff]   ;;  %v1049_v5 = vld [vmem:[#allocation7 + $0x8] sm:$0xff]   ;;  %v895_v13 = vld [vmem:[%s1637_s2] ss:$0 sm:$0xff]  ;;  %vm468_vm2 = vcmask 261120   ;;  %v1299_v30 = vmov 0  }
  0x8d   : > { %938 = vmatprep.subr.bf16.mxu1 %v1297_v0  ;;  %942 = vmatprep.mubr.msk.bf16.mxu1 %vm1298_vm0, %v1297_v0  ;;  %v1050_v6 = vld [vmem:[%s1549_s15] ss:$16 sps:$4 sm:$0xff]   ;;  %v1052_v7 = vld [vmem:[%s1549_s15 + $0x4] ss:$16 sps:$4 sm:$0xff]   ;;  %v1055_v8 = vld [vmem:[%s1549_s15 + $0xc] ss:$16 sps:$4 sm:$0xff]  }
  0x8e   : > { %933 = vmatpush3.bf16.msra.mxu0 %v1047_v1  ;;  %939 = vmatpush3.bf16.msra.mxu1 %v1048_v4  ;;  %v1058_v9 = vld [vmem:[%s1549_s15 + $0x24] ss:$16 sps:$4 sm:$0xff]   ;;  %v1056_v10 = vld [vmem:[%s1549_s15 + $0x20] ss:$16 sps:$4 sm:$0xff]   ;;  %v1053_v20 = vld [vmem:[%s1549_s15 + $0x8] ss:$16 sps:$4 sm:$0xff]  }
  0x8f   : > { %940 = vmatprep.subr.bf16.mxu1 %v1297_v0  ;;  %636 = vmatprep.subr.bf16.mxu0 %v1052_v7  ;;  %v1064_v11 = vld [vmem:[%s1549_s15 + $0x44] ss:$16 sps:$4 sm:$0xff]   ;;  %v1062_v12 = vld [vmem:[%s1549_s15 + $0x40] ss:$16 sps:$4 sm:$0xff]   ;;  %v1061_v22 = vld [vmem:[%s1549_s15 + $0x2c] ss:$16 sps:$4 sm:$0xff]  }
  0x90   : > { %v1059_v23 = vld [vmem:[%s1549_s15 + $0x28] ss:$16 sps:$4 sm:$0xff]   ;;  %v1067_v24 = vld [vmem:[%s1549_s15 + $0x4c] ss:$16 sps:$4 sm:$0xff]   ;;  %v1070_v26 = vld [vmem:[%s1549_s15 + $0x64] ss:$16 sps:$4 sm:$0xff]  }
  0x91   : > { %935 = vmatmul.mubr.msk.bf16.vlgmr.msra.gmra.mrb[0].mxu0 %vm399_vm1, %v386_v3  ;;  %v1065_v25 = vld [vmem:[%s1549_s15 + $0x48] ss:$16 sps:$4 sm:$0xff]   ;;  %v1073_v27 = vld [vmem:[%s1549_s15 + $0x6c] ss:$16 sps:$4 sm:$0xff]   ;;  %v1068_v28 = vld [vmem:[%s1549_s15 + $0x60] ss:$16 sps:$4 sm:$0xff]  }
  0x92   : > { %941 = vmatpush3.bf16.msra.mxu1 %v1049_v5  ;;  %637 = vmatpush1.bf16.msra.mxu0 %v1050_v6  ;;  %v1071_v29 = vld [vmem:[%s1549_s15 + $0x68] ss:$16 sps:$4 sm:$0xff]   ;;  %v898_v31 = vld [vmem:[%s1639_s4] ss:$0 sm:$0xff]  ;;  %vm632_vm3 = vcmask 523264   ;;  %s894_s21 = sshll.u32 %s1278_s27, 2 }
  0x93   : > { %677 = vmatprep.subr.bf16.mxu1 %v1055_v8  ;;  %638 = vmatprep.subr.bf16.mxu0 %v1058_v9  ;;  %p376_p7 = scmp.lt.s32.totalorder %s894_s21, 7  ;;  %v533_v40 = vshrl.u32 %v532_v39, 7  ;;  %s893_s12 = sshll.u32 %s1545_s13, 5 }
  0x94   : > { %668 = vmatprep.mubr.bf16.mxu0 %v1299_v30  ;;  %s926_s23 = sshll.u32 %s1278_s27, 9  ;;  %s1674_s10 = sld [smem:[#allocation17_spill]] }
  0x95   : > { %s1691_s21 = smov (!%p376_p7, %s894_s21), 7  ;;  %v534_v41 = vsub.s32 0, %v533_v40  ;;  %v542_v42 = vsub.s32 2, %v533_v40  ;;  %v538_v44 = vsub.s32 1, %v533_v40  ;;  %v546_v45 = vsub.s32 3, %v533_v40  ;;  %s373_s19 = scalar_lea.vmem [#allocation10], %s893_s12 }
  0x96   : > { %639 = vmatpush1.bf16.msra.mxu0 %v1056_v10  ;;  %s378_s7 = scalar_lea.vmem %s1641_s6, %s1691_s21  ;;  %s755_s8 = sshll.u32 %s373_s19, 4  ;;  %s1588_s8 = int_to_ptr.vmem [resolvable:$true] %s755_s8 }
  0x97   : > { %640 = vmatprep.subr.bf16.mxu0 %v1064_v11  ;;  %v529_v43 = vld [vmem:[%s378_s7] sm:$0xf]  ;;  %s1675_s18 = sld [smem:[#allocation19_spill]]  ;;  %s739_s27 = scalar_lea.sflag [#allocation4], %s1545_s13 }
  0x98   : > { %v535_v46 = vrot.slane %v529_v43, %v534_v41  ;;  %v543_v47 = vrot.slane %v529_v43, %v542_v42  ;;  %v539_v48 = vrot.slane %v529_v43, %v538_v44  ;;  %v547_v49 = vrot.slane %v529_v43, %v546_v45  ;;  %s1196_s9 = scalar_lea.vmem %s1588_s8, 512  ;;  %s1300_s11 = smov [#allocation10]  }
  0x99   : > { %p1197_p11 = scmp.ne.s32.totalorder %s1588_s8, %s1196_s9  ;;  %s1200_s20 = sshll.u32 %s1300_s11, 4  ;;  %s1201_s20 = int_to_ptr.vmem [resolvable:$false] %s1200_s20 }
  0x9a   : > { %641 = vmatpush1.bf16.msra.mxu0 %v1062_v12  ;;  %p1676_p4 = scmp.ne.s32.totalorder %s1674_s10, 0  ;;  %s1202_s16 = scalar_lea.vmem %s1201_s20, 1024 }
  0x9b   : > { %642 = vmatprep.subr.bf16.mxu0 %v1070_v26  ;;  %p1203_p9 = scmp.lt.s32.totalorder %s1588_s8, %s1201_s20  ;;  %p1204_p5 = scmp.lt.s32.totalorder %s1202_s16, %s1196_s9 }
  0x9c   : > { %p1198_p13 = pnand %p1197_p11, %p1676_p4 }
  0x9d   : > { %s1586_s15 = scalar_lea.hbm %s1675_s18, %s926_s23  ;;  %p1205_p3 = por %p1204_p5, %p1203_p9 }
  0x9e   : > { %643 = vmatpush1.bf16.msra.mxu0 %v1068_v28  ;;  %p1199_p1 = pneg %p1198_p13 }
  0xa0   : > { %p1206_p10 = pnand %p1205_p3, %p1199_p1 }
 0x164   : > { %v437_v14 = vpop.f32.mrb[0].mxu0 }
 0x165   : > { %v438_v15 = vadd.f32 %v895_v13, %v437_v14  ;;  %v936_v16 = vpop.f32.mrb[1].mxu0 }
 0x166   : > { %v440_v17 = vpop.f32.mrb[2].mxu0 }
 0x167   : > { %v443_v18 = vmax.f32 %v438_v15, 0.0  ;;  %v937_v19 = vpop.f32.mrb[3].mxu0 }
 0x169   : > { %v449_v21 = vpack.c.bf16 %v443_v18, %v443_v18 }
 0x16b   : > { %943 = vmatmul.mubr.msk.bf16.vlgmr.msra.gmra.mrb[0].mxu1 %vm468_vm2, %v449_v21 }
 0x16c   : > { %678 = vmatpush1.bf16.msra.mxu1 %v1053_v20  ;;  %709 = vmatprep.mubr.bf16.mxu1 %v1299_v30 }
 0x16d   : > { %679 = vmatprep.subr.bf16.mxu1 %v1061_v22 }
 0x170   : > { %680 = vmatpush1.bf16.msra.mxu1 %v1059_v23 }
 0x171   : > { %681 = vmatprep.subr.bf16.mxu1 %v1067_v24 }
 0x174   : > { %682 = vmatpush1.bf16.msra.mxu1 %v1065_v25 }
 0x175   : > { %683 = vmatprep.subr.bf16.mxu1 %v1073_v27 }
 0x178   : > { %684 = vmatpush1.bf16.msra.mxu1 %v1071_v29 }
 0x23e   : > { %v506_v32 = vpop.f32.mrb[0].mxu1 }
 0x23f   : > { %v507_v33 = vadd.f32 %v898_v31, %v506_v32  ;;  %v944_v34 = vpop.f32.mrb[1].mxu1 }
 0x240   : > { %v509_v35 = vpop.f32.mrb[2].mxu1 }
 0x241   : > { %v512_v36 = vmax.f32 %v507_v33, 0.0  ;;  %v945_v37 = vpop.f32.mrb[3].mxu1 }
 0x243   : > { %v530_v38 = vpack.c.bf16 %v512_v36, %v512_v36 }
 0x245   : > { %918 = vmatmul.mubr.msk.bf16.vlgmr.msra.gmra.mrb[4].mxu0 %vm632_vm3, %v530_v38  ;;  %919 = vmatmul.mubr.msk.bf16.vlgmr.msra.gmra.mrb[4].mxu1 %vm632_vm3, %v530_v38 }
 0x318   : > { %v670_v50 = vpop.f32.mrb[4].mxu0  ;;  %v711_v51 = vpop.f32.mrb[4].mxu1 }
 0x319   : > { %v671_v52 = vadd.f32 %v670_v50, %v535_v46  ;;  %v712_v53 = vadd.f32 %v711_v51, %v543_v47  ;;  %v672_v54 = vpop.f32.mrb[5].mxu0  ;;  %v713_v55 = vpop.f32.mrb[5].mxu1 }
 0x31a   : > { %v673_v56 = vadd.f32 %v672_v54, %v539_v48  ;;  %v714_v57 = vadd.f32 %v713_v55, %v547_v49  ;;  %v674_v58 = vpop.f32.mrb[6].mxu0  ;;  %v715_v59 = vpop.f32.mrb[6].mxu1 }
 0x31b   : > { %v718_v60 = vmul.f32 0.5, %v671_v52  ;;  %v720_v61 = vmul.f32 0.5, %v712_v53  ;;  %v675_v62 = vpop.f32.mrb[7].mxu0  ;;  %v716_v63 = vpop.f32.mrb[7].mxu1 }
 0x31c   : > { %v719_v0 = vmul.f32 0.5, %v673_v56  ;;  %v721_v1 = vmul.f32 0.5, %v714_v57 }
 0x31d   : > { %1074 = vtanh.f32 %v718_v60 }
 0x31e   : > { %1076 = vtanh.f32 %v720_v61 }
 0x31f   : > { %1078 = vtanh.f32 %v719_v0 }
 0x320   : > { %1080 = vtanh.f32 %v721_v1 }
 0x327   : > { %v1075_v2 = vpop.eup %1074 }
 0x328   : > { %v1077_v3 = vpop.eup %1076  ;;  %v726_v4 = vmul.f32 0.5, %v1075_v2 }
 0x329   : > { %v1079_v5 = vpop.eup %1078  ;;  %v728_v6 = vmul.f32 0.5, %v1077_v3 }
 0x32a   : > { %v1081_v7 = vpop.eup %1080  ;;  %v730_v8 = vadd.f32 0.5, %v726_v4  ;;  %v727_v9 = vmul.f32 0.5, %v1079_v5 }
 0x32b   : > { %v732_v10 = vadd.f32 0.5, %v728_v6  ;;  %v729_v11 = vmul.f32 0.5, %v1081_v7 }
 0x32c   : > { %734 = vst [vmem:[%s373_s19] sm:$0xff] %v730_v8  ;;  %v731_v12 = vadd.f32 0.5, %v727_v9 }
 0x32d   : > { %736 = vst [vmem:[%s373_s19 + $0x10] sm:$0xff] %v732_v10  ;;  %v733_v13 = vadd.f32 0.5, %v729_v11 }
 0x32e   : > { %735 = vst [vmem:[%s373_s19 + $0x8] sm:$0xff] %v731_v12 }
 0x32f   : > { %737 = vst [vmem:[%s373_s19 + $0x18] sm:$0xff] %v733_v13 }
 0x330   : > { %1209 = shalt.err (!%p1206_p10)
}
 0x331   : > { %s1210_s13 = scalar_lea.hbm %s1586_s15, 512  ;;  %s1214_s22 = scalar_lea.hbm %s1675_s18, 1024 }
 0x332   : > { %p1211_p0 = scmp.ne.s32.totalorder %s1586_s15, %s1210_s13  ;;  %p1215_p12 = scmp.lt.u32.totalorder %s1586_s15, %s1675_s18 }
 0x333   : > { %p1216_p6 = scmp.lt.u32.totalorder %s1214_s22, %s1210_s13  ;;  %p1218_p11 = scmp.lt.u32.totalorder %s1210_s13, %s1586_s15 }
 0x334   : > { %p1212_p2 = pnand %p1211_p0, %p1676_p4 }
 0x335   : > { %p1217_p7 = por %p1216_p6, %p1215_p12 }
 0x336   : > { %p1213_p8 = pneg %p1212_p2 }
 0x337   : > { %p1219_p13 = por %p1218_p11, %p1217_p7 }
 0x339   : > { %p1220_p1 = pnand %p1219_p13, %p1213_p8 }
 0x33b   : > { %1223 = shalt.err (!%p1220_p1)
}
 0x33c   : > { %960 = dma.vmem_to_hbm [thread:$0]  (%p1676_p4), %s1588_s8, 512, %s1586_s15, %s739_s27  }
 0x33d PF: > { %s1677_s23 = sld [smem:[#allocation15_spill]]  ;;  %s1678_s19 = sld [smem:[#allocation18_spill]] }
 0x33e   : > { %s1679_s24 = sld [smem:[#allocation16_spill]] }
 0x343   : > { %s767_s14 = sand.u32 1, %s1677_s23   ;;  %p1680_p9 = scmp.ne.s32.totalorder %s1678_s19, 0 }
 0x344   : > { %p1681_p5 = scmp.ge.s32.totalorder %s1679_s24, 2  ;;  %s768_s9 = scalar_lea.sflag [#allocation4], %s767_s14 }
 0x346   : > { %p977_p3 = pnand %p1681_p5, %p1680_p9 }
 0x348   : > { %1261 = dma.done.wait (!%p977_p3), %s768_s9, 512  }
 0x349   : > { %1263 = vsyncadd (!%p977_p3), %s768_s9, 4294966784  ;;  %s25_s11 = sadd.s32 1, %s1679_s24   ;;  %s1682_s24 = smov %s1270_s25 }
 0x34a   : > { %p22_p10 = scmp.ge.s32.totalorder %s25_s11, 4   ;;  %s1683_s25 = smov %s1274_s26 }
 0x34b   : > { %s1684_s26 = smov %s1504_s29  ;;  %s1685_s27 = smov %s1282_s28 }
 0x34c   : > { %s1686_s28 = smov %s1689_s30  ;;  %s1687_s29 = smov %s25_s11 }
 0x34d   :  { %24 = sbr.rel (!%p22_p10) target bundleno = 10 (0xa), region = 110 }
 0x354   :  { %773 = vsyncpa [#allocation3], 1 }
 0x355   :  { %775 = vsyncpa [#allocation3 + $0x1], 1 }
 0x356   :  { %776 = vsyncpa [#allocation6], 1 }
 0x357   :  { %777 = vsyncpa [#allocation9], 1 }
 0x358   :  { %779 = vsyncpa [#allocation9 + $0x1], 1 }
 0x359   :  { %780 = vsyncpa [#allocation4], 1 }
 0x35a   :  { %782 = vsyncpa [#allocation4 + $0x1], 1 }

</bundles_post_ra>
